<compile_context>
chip_gen: v7x
topology: tpu7x:2x2x1
jax: 0.10.0
libtpu: 0.0.40
codegen_flags: <defaults>
</compile_context>

<pallas_src>
import jax
import jax.numpy as jnp
from jax.experimental import pallas as pl
from jax.experimental.pallas import tpu as pltpu


def _copy_kernel(x_ref, o_ref):
    # Elementwise pass-through on the current VMEM tile.
    o_ref[...] = x_ref[...]


_LANE = 128
_MAX_LANES = 2048                      # cap on lane-dense slab width
_BLOCK_BYTES_BUDGET = 2 * 1024 * 1024  # ~2 MiB/block; x2 operands x2 buffers = 8 MiB


def _sublane_pack(dtype):
    """Row-tile granularity: 8 for f32, 16 for bf16, 32 for int8/fp8."""
    itemsize = jnp.dtype(dtype).itemsize
    return max(1, 4 // itemsize) * 8


def _choose_layout(n, dtype):
    """Pick a lane-dense (rows, cols) slab and a row-tile size for n elements."""
    itemsize = jnp.dtype(dtype).itemsize
    cols = 0
    for m in range(min(_MAX_LANES, n) // _LANE, 0, -1):
        c = m * _LANE
        if n % c == 0:
            cols = c
            break
    if cols == 0:
        # n is not a multiple of 128: fall back to a single whole-array block.
        # TODO(synk): very large non-128-multiple inputs are not tiled here.
        return 1, n, 1
    rows = n // cols
    pack = _sublane_pack(dtype)
    max_rows = max(pack, (_BLOCK_BYTES_BUDGET // (cols * itemsize)) // pack * pack)
    tile_rows = min(rows, max_rows)
    return rows, cols, tile_rows


def _identity_pallas(x):
    """Streaming copy of `x` through VMEM as a lane-dense 2-D slab (no padding)."""
    n = x.size
    if n == 0:
        return x
    rows, cols, tile_rows = _choose_layout(n, x.dtype)
    x2d = x.reshape(rows, cols)  # metadata-only reshape, no extra HBM traffic
    nbytes = n * jnp.dtype(x.dtype).itemsize

    if rows <= tile_rows:
        grid = (1,)
        block = (rows, cols)          # block == full array dims (always legal)
    else:
        grid = (pl.cdiv(rows, tile_rows),)
        block = (tile_rows, cols)     # multiples of (sublane pack, 128)

    out = pl.pallas_call(
        _copy_kernel,
        out_shape=jax.ShapeDtypeStruct((rows, cols), x.dtype),
        grid=grid,
        in_specs=[pl.BlockSpec(block, lambda i: (i, 0))],
        out_specs=pl.BlockSpec(block, lambda i: (i, 0)),
        compiler_params=pltpu.CompilerParams(
            # Single row axis, parallel so v7x can split it across both TCs.
            dimension_semantics=("parallel",),
            # Headroom for the double-buffered blocks (v5e default scoped is 16 MiB).
            vmem_limit_bytes=32 << 20,
        ),
        cost_estimate=pl.CostEstimate(
            flops=0, transcendentals=0, bytes_accessed=2 * nbytes
        ),
    )(x2d)
    return out.reshape(x.shape)


class Layer:
    """JAX/Pallas analogue of pyjet's abstract `Layer` base class."""

    def __init__(self):
        self.built = False
        self.build_hook = None

    def register_builder(self, builder_func, *args, **kwargs):
        def builder_wrapper(inputs):
            if not self.built:
                assert self.build_hook is not None, "Builder has not been registered!!"
                builder_func(*inputs, *args, **kwargs)
                self.built = True
                self.build_hook = None  # "remove" the hook
        self.build_hook = builder_wrapper
        return builder_wrapper

    def forward(self, x):
        """Abstract forward realized as a Pallas identity pass-through."""
        return _identity_pallas(x)

    def __call__(self, x):
        if self.build_hook is not None:
            self.build_hook((x,))
        return self.forward(x)

    def reset_parameters(self):
        pass

    def weight(self, *args, **kwargs):
        raise NotImplementedError()

    def __str__(self):
        return self.__class__.__name__ + "()"

    def __repr__(self):
        return str(self)


if __name__ == "__main__":
    key = jax.random.PRNGKey(0)
    # NCHW input, small shapes (2*4*16*16 = 2048 elems -> lane-dense (1, 2048) slab).
    x = jax.random.normal(key, (2, 4, 16, 16), dtype=jnp.float32)

    layer = Layer()
    # No parameters to build; register a trivial builder to exercise the hook.
    layer.register_builder(lambda *inputs: None)

    y = layer(x)
    y = jax.block_until_ready(y)

    assert y.shape == x.shape
    assert jnp.array_equal(y, x), "identity pass-through mismatch"
    print("KERNEL_OK")
</pallas_src>

<mosaic_0001>
module attributes {stable_mosaic.version = 11 : i64} {
  func.func @_copy_kernel(%arg0: i32, %arg1: memref<1x2048xf32, #tpu.memory_space<vmem>>, %arg2: memref<1x2048xf32, #tpu.memory_space<vmem>>) attributes {dimension_semantics = [#tpu.dimension_semantics<parallel>], iteration_bounds = array<i64: 1>, scalar_prefetch = 0 : i64, scratch_operands = 0 : i64, tpu.core_type = #tpu.core_type<tc>, window_params = [{transform_indices = @transform_0, window_bounds = array<i64: 1, 2048>}, {transform_indices = @transform_1, window_bounds = array<i64: 1, 2048>}]} {
    %c0 = arith.constant 0 : index
    %c0_0 = arith.constant 0 : index
    %0 = vector.load %arg1[%c0, %c0_0] : memref<1x2048xf32, #tpu.memory_space<vmem>>, vector<1x2048xf32>
    %c0_1 = arith.constant 0 : index
    %c0_2 = arith.constant 0 : index
    %1 = vector.load %arg2[%c0_1, %c0_2] : memref<1x2048xf32, #tpu.memory_space<vmem>>, vector<1x2048xf32>
    tpu.vector_store %arg2[%c0_1, %c0_2], %0 {strides = array<i32>} : memref<1x2048xf32, #tpu.memory_space<vmem>>, vector<1x2048xf32>,
    return
  }
  func.func @transform_0(%arg0: i32) -> (i32, i32) {
    %c0_i32 = arith.constant 0 : i32
    %c0_i32_0 = arith.constant 0 : i32
    return %arg0, %c0_i32 : i32, i32
  }
  func.func @transform_1(%arg0: i32) -> (i32, i32) {
    %c0_i32 = arith.constant 0 : i32
    %c0_i32_0 = arith.constant 0 : i32
    return %arg0, %c0_i32 : i32, i32
  }
}

</mosaic_0001>

<bundles_post_ra>
// kernel: tpu_custom_call.1
= control target key start
LH: loop header
LB: loop body
LE: loop exit
PB: predicated region body
PF: predicated region fallthrough
CT: control target
= control target key end

     0   :  { %6 = vsyncpa [#allocation3], 0  ;;  %s126_s0 = inlined_call_operand.hbm [shape: f32[1,2048], index: 0, kind: input, shape index: {}]   ;;  %s127_s1 = inlined_call_operand.hbm [shape: f32[1,2048], index: 1, kind: output, shape index: {}]  }
   0x1   :  { %7 = vsyncpa [#allocation4], 0  ;;  %s90_s6 = smov [#allocation2]   ;;  %s42_s10 = scalar_lea.hbm %s126_s0, 256 }
   0x2   :  { %s14_s7 = sshll.u32 %s90_s6, 4  ;;  %p43_p0 = scmp.ne.s32.totalorder %s126_s0, %s42_s10  ;;  %s15_s7 = int_to_ptr.vmem [resolvable:$true] %s14_s7 }
   0x3   :  { %p46_p1 = scmp.lt.u32.totalorder %s42_s10, %s126_s0 }
   0x5   :  { %p48_p2 = pnand %p46_p1, %p43_p0 }
   0x7   :  { %51 = shalt.err (!%p48_p2)
}
   0x8   :  { %s52_s15 = scalar_lea.vmem %s15_s7, 256  ;;  %p57_p4 = scmp.lt.s32.totalorder %s15_s7, %s15_s7 }
   0x9   :  { %p53_p3 = scmp.ne.s32.totalorder %s15_s7, %s52_s15  ;;  %p58_p5 = scmp.lt.s32.totalorder %s52_s15, %s52_s15 }
   0xb   :  { %p59_p6 = por %p58_p5, %p57_p4 }
   0xd   :  { %p60_p7 = pnand %p59_p6, %p53_p3 }
   0xf   :  { %63 = shalt.err (!%p60_p7)
}
  0x10   :  { %17 = dma.hbm_to_vmem [thread:$0]  %s126_s0, 256, %s15_s7, [#allocation3]  }
  0x11   :  { %86 = dma.done.wait [#allocation3], 256  }
  0x12   :  { %87 = vsyncadd [#allocation3], 4294967040  ;;  %s91_s18 = smov [#allocation5]   ;;  %v21_v0 = vld [vmem:[#allocation2] sm:$0xff]  ;;  %v22_v1 = vld [vmem:[#allocation2 + $0x8] sm:$0xff] }
  0x13   :  { %s31_s19 = sshll.u32 %s91_s18, 4  ;;  %23 = vst [vmem:[#allocation5] sm:$0xff] %v21_v0  ;;  %24 = vst [vmem:[#allocation5 + $0x8] sm:$0xff] %v22_v1  ;;  %s32_s19 = int_to_ptr.vmem [resolvable:$true] %s31_s19 }
  0x14   :  { %s64_s20 = scalar_lea.vmem %s32_s19, 256  ;;  %p69_p9 = scmp.lt.s32.totalorder %s32_s19, %s32_s19 }
  0x15   :  { %p65_p8 = scmp.ne.s32.totalorder %s32_s19, %s64_s20  ;;  %p70_p10 = scmp.lt.s32.totalorder %s64_s20, %s64_s20 }
  0x17   :  { %p71_p11 = por %p70_p10, %p69_p9 }
  0x19   :  { %p72_p12 = pnand %p71_p11, %p65_p8 }
  0x1b   :  { %75 = shalt.err (!%p72_p12)
}
  0x1c   :  { %s76_s0 = scalar_lea.hbm %s127_s1, 256 }
  0x1d   :  { %p77_p13 = scmp.ne.s32.totalorder %s127_s1, %s76_s0  ;;  %p80_p0 = scmp.lt.u32.totalorder %s76_s0, %s127_s1 }
  0x1f   :  { %p82_p1 = pnand %p80_p0, %p77_p13 }
  0x21   :  { %85 = shalt.err (!%p82_p1)
}
  0x22   :  { %34 = dma.vmem_to_hbm [thread:$0]  %s32_s19, 256, %s127_s1, [#allocation4]  }
  0x23   :  { %88 = dma.done.wait [#allocation4], 256  }
  0x24   :  { %89 = vsyncadd [#allocation4], 4294967040 }
  0x25   :  { %38 = vsyncpa [#allocation3], 1 }
  0x26   :  { %39 = vsyncpa [#allocation4], 1 }

</bundles_post_ra>
